<compile_context>
chip_gen: v5e
topology: v5e:2x2
jax: 0.10.0
libtpu: 0.0.40
codegen_flags: <defaults>
</compile_context>

<pallas_src>
import jax
import jax.numpy as jnp
from jax.experimental import pallas as pl
from jax.experimental.pallas import tpu as pltpu

_LANE = 128
_SUBLANE = 8


def _round_up(x, m):
    return -(-x // m) * m


def _add_pos_kernel(x_ref, pos_ref, o_ref):
    # x_ref/o_ref: (TB, TN) tile; pos_ref: (1, TN) tile -> sublane-broadcast add.
    o_ref[...] = (x_ref[...] + pos_ref[...]).astype(o_ref.dtype)


def _tpu_config():
    """Generation-aware block budget / scoped-VMEM limit / core count."""
    try:
        kind = jax.devices()[0].device_kind.lower()
    except Exception:
        kind = ""
    if "v7" in kind:
        # 2 TCs/chip, 64 MiB physical VMEM/TC, 3.2 TB/s HBM: big blocks amortize
        # the ~0.35 us per-step overhead; raise the scoped limit explicitly.
        return {"budget": 24 << 20, "vmem_limit": 48 << 20, "cores": 2}
    if "v6" in kind:
        # 128 MiB physical VMEM, 32 MiB default scoped limit -> raise explicitly.
        return {"budget": 24 << 20, "vmem_limit": 64 << 20, "cores": 1}
    # v5e / unknown: default scoped VMEM is 16 MiB; ~2 MiB x blocks already hide
    # the per-step overhead at ~820 GB/s, so stay conservative.
    return {"budget": 12 << 20, "vmem_limit": None, "cores": 1}


def _choose_tiles(B, N, x_itemsize, pos_itemsize, vmem_budget):
    """Pick (batch_tile, feature_tile) for the flattened (B, S*E) view.

    Sizes tiles so the double-buffered VMEM footprint
        2*(x block) + 2*(out block) + 2*(pos block padded to 8 sublanes)
    stays within `vmem_budget` (both dtypes accounted for).
    """
    n_pad = _round_up(N, _LANE)
    # Minimal batch tile: whole batch when small (full-dim block is legal),
    # otherwise 8 sublanes.
    tb = B if B <= _SUBLANE else _SUBLANE
    padded_tb = _round_up(tb, _SUBLANE)

    # Bytes per feature column across all double-buffered blocks:
    #   x + out : 2 buffers each * padded_tb rows * x_itemsize
    #   pos     : 2 buffers * 8 sublane-padded rows * pos_itemsize
    per_lane = 2 * (2 * padded_tb * x_itemsize + _SUBLANE * pos_itemsize)
    max_tn = max(_LANE, (vmem_budget // per_lane) // _LANE * _LANE)
    tn = min(n_pad, max_tn)

    # If the feature axis (not the byte budget) capped tn, grow the batch tile
    # so each grid step still moves a budget-sized chunk (8-16x fewer steps for
    # small-N / large-B shapes).
    if tn == n_pad and B > _SUBLANE:
        pos_bytes = 2 * _SUBLANE * tn * pos_itemsize
        tb_fit = (vmem_budget - pos_bytes) // (4 * tn * x_itemsize)
        tb_fit = (tb_fit // _SUBLANE) * _SUBLANE
        tb_cap = (B // _SUBLANE) * _SUBLANE          # keep tb <= B
        tb = max(_SUBLANE, min(tb_cap, tb_fit))
    return tb, tn


def _split_for_cores(B, N, tb, tn, cores):
    """Ensure a multi-TC chip (v7x) gets >= 2 grid steps to shard."""
    if cores < 2:
        return tb, tn
    steps = pl.cdiv(N, tn) * pl.cdiv(B, tb)
    if steps >= 2:
        return tb, tn
    n_pad = _round_up(N, _LANE)
    if n_pad >= 2 * _LANE:
        tn = _round_up(pl.cdiv(n_pad, 2), _LANE)     # 2 feature tiles
    elif B >= 2 * _SUBLANE:
        tb = max(_SUBLANE, _round_up(pl.cdiv(B, 2), _SUBLANE))  # 2 batch tiles
    return tb, tn


def learned_positional_encoding_1d(x, pos_embedding, *, donate_x=False):
    """x: [B, S, E]; pos_embedding: [1, max_seq_len, E].

    Returns x + pos_embedding[:, :S, :] (eval-mode dropout == identity).
    """
    B, S, E = x.shape
    one, max_seq_len, e2 = pos_embedding.shape
    assert one == 1 and e2 == E and S <= max_seq_len

    N = S * E
    x_itemsize = jnp.dtype(x.dtype).itemsize
    pos_itemsize = jnp.dtype(pos_embedding.dtype).itemsize

    # Metadata-only reshapes: lane-dense 2D views (no HBM copies). Do NOT go
    # back to a 3D (B, S, E) layout: a 32-wide last dim would force masked
    # partial stores and re-fetch the pos tile per batch step.
    x2 = x.reshape(B, N)
    pos2 = pos_embedding.reshape(1, max_seq_len * E)  # prefix [:N] == pos[:, :S, :]

    cfg = _tpu_config()
    tb, tn = _choose_tiles(B, N, x_itemsize, pos_itemsize, cfg["budget"])
    tb, tn = _split_for_cores(B, N, tb, tn, cfg["cores"])

    # Batch axis innermost -> pos block index is constant across consecutive
    # steps, so Pallas fetches each pos tile exactly once.
    grid = (pl.cdiv(N, tn), pl.cdiv(B, tb))

    cp_kwargs = {"dimension_semantics": ("parallel", "parallel")}
    if cfg["vmem_limit"] is not None:
        cp_kwargs["vmem_limit_bytes"] = cfg["vmem_limit"]

    out2 = pl.pallas_call(
        _add_pos_kernel,
        out_shape=jax.ShapeDtypeStruct((B, N), x.dtype),
        grid=grid,
        in_specs=[
            pl.BlockSpec((tb, tn), lambda n, b: (b, n)),   # x tile
            pl.BlockSpec((1, tn), lambda n, b: (0, n)),    # pos tile (broadcast over batch)
        ],
        out_specs=pl.BlockSpec((tb, tn), lambda n, b: (b, n)),
        compiler_params=pltpu.CompilerParams(**cp_kwargs),
        cost_estimate=pl.CostEstimate(
            flops=B * N,
            transcendentals=0,
            bytes_accessed=2 * B * N * x_itemsize + N * pos_itemsize,
        ),
        input_output_aliases={0: 0} if donate_x else {},
    )(x2, pos2)

    return out2.reshape(B, S, E)


if __name__ == "__main__":
    # Small shapes consistent with the module's forward.
    batch = 2
    seq_len = 8
    emb_size = 32
    max_seq_len = 16
    # dropout_p = 0.1 -> inference mode (identity)

    key = jax.random.PRNGKey(0)
    kx, kp = jax.random.split(key)

    x = jax.random.normal(kx, (batch, seq_len, emb_size), dtype=jnp.float32)
    # Deterministic init of the learnable parameter (torch.randn equivalent).
    pos_embedding = jax.random.normal(kp, (1, max_seq_len, emb_size), dtype=jnp.float32)

    out = jax.block_until_ready(learned_positional_encoding_1d(x, pos_embedding))
    ref = x + pos_embedding[:, :seq_len, :]
    assert out.shape == (batch, seq_len, emb_size)
    assert jnp.allclose(out, ref, atol=1e-6), "mismatch vs reference"

    # Tail-masking check: S*E not a multiple of 128 and B not a multiple of 8.
    x_odd = jax.random.normal(kx, (3, 5, emb_size), dtype=jnp.float32)
    out_odd = jax.block_until_ready(learned_positional_encoding_1d(x_odd, pos_embedding))
    ref_odd = x_odd + pos_embedding[:, :5, :]
    assert out_odd.shape == (3, 5, emb_size)
    assert jnp.allclose(out_odd, ref_odd, atol=1e-6), "mismatch vs reference (unaligned)"

    print("KERNEL_OK")
</pallas_src>

<mosaic_0001>
module attributes {stable_mosaic.version = 11 : i64} {
  func.func @_add_pos_kernel(%arg0: i32, %arg1: i32, %arg2: memref<2x256xf32, #tpu.memory_space<vmem>>, %arg3: memref<1x256xf32, #tpu.memory_space<vmem>>, %arg4: memref<2x256xf32, #tpu.memory_space<vmem>>) attributes {dimension_semantics = [#tpu.dimension_semantics<parallel>, #tpu.dimension_semantics<parallel>], iteration_bounds = array<i64: 1, 1>, scalar_prefetch = 0 : i64, scratch_operands = 0 : i64, tpu.core_type = #tpu.core_type<tc>, window_params = [{transform_indices = @transform_0, window_bounds = array<i64: 2, 256>}, {transform_indices = @transform_1, window_bounds = array<i64: 1, 256>}, {transform_indices = @transform_2, window_bounds = array<i64: 2, 256>}]} {
    %c0 = arith.constant 0 : index
    %c0_0 = arith.constant 0 : index
    %0 = vector.load %arg2[%c0, %c0_0] : memref<2x256xf32, #tpu.memory_space<vmem>>, vector<2x256xf32>
    %c0_1 = arith.constant 0 : index
    %c0_2 = arith.constant 0 : index
    %1 = vector.load %arg3[%c0_1, %c0_2] : memref<1x256xf32, #tpu.memory_space<vmem>>, vector<1x256xf32>
    %2 = vector.broadcast %1 : vector<1x256xf32> to vector<2x256xf32>
    %3 = arith.addf %0, %2 : vector<2x256xf32>
    %c0_3 = arith.constant 0 : index
    %c0_4 = arith.constant 0 : index
    %4 = vector.load %arg4[%c0_3, %c0_4] : memref<2x256xf32, #tpu.memory_space<vmem>>, vector<2x256xf32>
    tpu.vector_store %arg4[%c0_3, %c0_4], %3 {strides = array<i32>} : memref<2x256xf32, #tpu.memory_space<vmem>>, vector<2x256xf32>,
    return
  }
  func.func @transform_0(%arg0: i32, %arg1: i32) -> (i32, i32) {
    %c0_i32 = arith.constant 0 : i32
    return %arg1, %arg0 : i32, i32
  }
  func.func @transform_1(%arg0: i32, %arg1: i32) -> (i32, i32) {
    %c0_i32 = arith.constant 0 : i32
    %c0_i32_0 = arith.constant 0 : i32
    return %c0_i32, %arg0 : i32, i32
  }
  func.func @transform_2(%arg0: i32, %arg1: i32) -> (i32, i32) {
    %c0_i32 = arith.constant 0 : i32
    return %arg1, %arg0 : i32, i32
  }
}

</mosaic_0001>

<bundles_post_ra>
// kernel: tpu_custom_call.1
= control target key start
LH: loop header
LB: loop body
LE: loop exit
PB: predicated region body
PF: predicated region fallthrough
CT: control target
= control target key end

     0   :  { %7 = vsyncpa [#allocation3], 0  ;;  %s177_s0 = inlined_call_operand.hbm [shape: f32[2,256], index: 0, kind: input, shape index: {}]   ;;  %s178_s1 = inlined_call_operand.hbm [shape: f32[1,512], index: 1, kind: input, shape index: {}]   ;;  %s179_s2 = inlined_call_operand.hbm [shape: f32[2,256], index: 2, kind: output, shape index: {}]  }
   0x1   :  { %8 = vsyncpa [#allocation6], 0 }
   0x2   :  { %9 = vsyncpa [#allocation4], 0  ;;  %s15_s11 = sshll.u32 %s177_s0, 4  ;;  %s150_s12 = smov [#allocation2]   ;;  %s16_s11 = int_to_ptr.hbm [resolvable:$true] %s15_s11 }
   0x3   :  { %s17_s13 = sshll.u32 %s150_s12, 4  ;;  %s26_s16 = sshll.u32 %s178_s1, 4  ;;  %s18_s13 = int_to_ptr.vmem [resolvable:$true] %s17_s13  ;;  %s27_s16 = int_to_ptr.hbm [resolvable:$true] %s26_s16 }
   0x4   :  { %20 = dma.hbm_to_vmem [thread:$0]  %s16_s11, 64, %s18_s13, [#allocation3]  }
   0x5   :  { %s151_s17 = smov [#allocation5]  }
   0x6   :  { %s28_s18 = sshll.u32 %s151_s17, 4  ;;  %s29_s18 = int_to_ptr.vmem [resolvable:$true] %s28_s18 }
   0x7   :  { %31 = dma.hbm_to_vmem [thread:$0]  %s27_s16, 32, %s29_s18, [#allocation6]  }
   0x8   :  { %144 = dma.done.wait [#allocation3], 64  }
   0x9   :  { %145 = vsyncadd [#allocation3], 4294967232 }
   0xa   :  { %146 = dma.done.wait [#allocation6], 32  }
   0xb   :  { %147 = vsyncadd [#allocation6], 4294967264  ;;  %v41_v0 = vld [vmem:[#allocation5] sm:$0x3]  ;;  %vm46_vm0 = vcmask 1041408   ;;  %s152_s0 = smov [#allocation7]  }
   0xc   :  { %v43_v1 = vperm.slane %v41_v0, 0  ;;  %v44_v2 = vperm.slane %v41_v0, 1  ;;  %v40_v3 = vld [vmem:[#allocation2] sm:$0xf]  ;;  %s56_s19 = sshll.u32 %s152_s0, 4  ;;  %s58_s21 = sshll.u32 %s179_s2, 4  ;;  %s57_s19 = int_to_ptr.vmem [resolvable:$true] %s56_s19  ;;  %s59_s21 = int_to_ptr.hbm [resolvable:$true] %s58_s21 }
   0xe   :  { %v45_v4 = vrot.slane %v44_v2, 6 }
  0x10   :  { %v47_v5 = vsel %vm46_vm0, %v43_v1, %v45_v4 }
  0x11   :  { %v49_v6 = vadd.f32 %v47_v5, %v40_v3 }
  0x13   :  { %50 = vst [vmem:[#allocation7] sm:$0xf] %v49_v6 }
  0x14   :  { %61 = dma.vmem_to_hbm [thread:$0]  %s57_s19, 64, %s59_s21, [#allocation4]  }
  0x15   :  { %148 = dma.done.wait [#allocation4], 64  }
  0x16   :  { %149 = vsyncadd [#allocation4], 4294967232 }
  0x17   :  { %66 = vsyncpa [#allocation3], 1 }
  0x18   :  { %67 = vsyncpa [#allocation6], 1 }
  0x19   :  { %68 = vsyncpa [#allocation4], 1 }

</bundles_post_ra>
